<compile_context>
chip_gen: v7x
topology: tpu7x:2x2x1
jax: 0.10.0
libtpu: 0.0.40
codegen_flags: <defaults>
</compile_context>

<pallas_src>
import jax
import jax.numpy as jnp
from jax.experimental import pallas as pl
from jax.experimental.pallas import tpu as pltpu


def _tgaa_head_kernel(m0_ref, x0_ref, m1_ref, x1_ref, m2_ref, x2_ref,
                      w1_ref, b1_ref, w2_ref, b2_ref, out_ref):
    """Masked-sum readout (VPU) + per-dim Linear+ReLU + fused lin2 (MXU)."""

    def branch(i, m_ref, x_ref):
        # pooled[b, h] = sum_n mask[b, n] * x[b, n, h]
        # VPU multiply + sublane reduce: no M=1 MXU matvec pushes, overlaps
        # with the dense_x DMA of the next grid step.  f32 accumulate (v5e's
        # VPU has no bf16).
        m = m_ref[...].astype(jnp.float32)
        x = x_ref[...].astype(jnp.float32)
        pooled = jnp.sum(x * m[:, :, None], axis=1)               # (TB, H) f32

        # h_i = relu(lin1s[i](pooled_i)) -- full-width dot (no block-diagonal).
        h = jnp.dot(pooled.astype(w1_ref.dtype), w1_ref[i],
                    preferred_element_type=jnp.float32)
        h = jnp.maximum(h + b1_ref[i].astype(jnp.float32), 0.0)   # (TB, FH)

        # Partial lin2: h_i @ W2[i*FH:(i+1)*FH, :].  Summing the three partials
        # equals lin2(concat(h0, h1, h2)) and avoids materializing the
        # non-lane-aligned (TB, 3*FH) concat.
        return jnp.dot(h.astype(w2_ref.dtype), w2_ref[i],
                       preferred_element_type=jnp.float32)        # (TB, OUTp)

    out = branch(0, m0_ref, x0_ref)
    out = out + branch(1, m1_ref, x1_ref)
    out = out + branch(2, m2_ref, x2_ref)
    out_ref[...] = (out + b2_ref[...].astype(jnp.float32)).astype(out_ref.dtype)


def pack_tgaa_head_params(lin1_ws, lin1_bs, lin2_w, lin2_b,
                          *, param_dtype=jnp.bfloat16):
    """One-time packing of the readout-head parameters.

    Call at parameter-init time (or inside a cached jit), NOT per forward
    call, so the stacking / lane-padding / dtype-cast HBM traffic is paid once.

    lin1_ws: 3 arrays (H, FH)   lin1s[i].weight.T
    lin1_bs: 3 arrays (FH,)     lin1s[i].bias
    lin2_w:  (3*FH, OUT)        lin2.weight.T
    lin2_b:  (OUT,)             lin2.bias
    """
    H, FH = lin1_ws[0].shape
    assert all(w.shape == (H, FH) for w in lin1_ws), \
        "all lin1 weights must share the same (hidden, final_hidden) shape"
    assert all(b.reshape(-1).shape == (FH,) for b in lin1_bs)
    k2, out_size = lin2_w.shape
    assert k2 == 3 * FH, "lin2 in-features must be 3 * final_hidden"

    out_pad = max(128, -(-out_size // 128) * 128)     # lane-dense output width

    w1_stack = jnp.stack([w.astype(param_dtype) for w in lin1_ws], axis=0)
    b1_stack = jnp.stack([b.reshape(FH).astype(param_dtype) for b in lin1_bs],
                         axis=0)
    w2_stack = jnp.zeros((3, FH, out_pad), param_dtype)
    w2_stack = w2_stack.at[:, :, :out_size].set(
        lin2_w.reshape(3, FH, out_size).astype(param_dtype))
    b2_pad = jnp.zeros((1, out_pad), param_dtype)
    b2_pad = b2_pad.at[:, :out_size].set(
        lin2_b.reshape(1, out_size).astype(param_dtype))
    return {"w1": w1_stack, "b1": b1_stack, "w2": w2_stack, "b2": b2_pad,
            "out_size": out_size}


def tgaa_readout_head(masks, dense_xs, packed, *, batch_tile=256,
                      vmem_limit_bytes=None):
    """Fused TGAA readout head.

    masks:    3 arrays (B, N_i)      x_mask per cell dimension (0/1)
    dense_xs: 3 arrays (B, N_i, H)   dense per-cell features (conv-stack output)
    packed:   dict from pack_tgaa_head_params()

    batch_tile guidance: v5e -> 128 (or raise vmem_limit_bytes), v6e -> 512
    with vmem_limit_bytes ~48-64 MiB, v7x -> <= 512 and keep B/batch_tile >= 4
    so both TensorCores get >= 2 pipelined steps.
    """
    assert len(masks) == 3 and len(dense_xs) == 3
    B = masks[0].shape[0]
    H = dense_xs[0].shape[-1]
    w1, b1, w2, b2 = packed["w1"], packed["b1"], packed["w2"], packed["b2"]
    out_size = packed["out_size"]
    FH = w1.shape[-1]
    out_pad = w2.shape[-1]

    # --- batch tiling (parallel grid; 2 TCs on v7x, VMEM-bounded per step) ---
    if B > batch_tile:
        assert batch_tile % 8 == 0, "batch_tile must be a multiple of 8"
        tb = batch_tile
        bp = -(-B // tb) * tb
        pad = bp - B
        if pad:
            # Padded rows produce relu(b1) @ W2 + b2; sliced off below.
            masks = [jnp.pad(m, ((0, pad), (0, 0))) for m in masks]
            dense_xs = [jnp.pad(x, ((0, pad), (0, 0), (0, 0)))
                        for x in dense_xs]
    else:
        tb, bp = B, B
    grid = (bp // tb,)

    def _batched_spec(arr):
        if arr.ndim == 2:
            return pl.BlockSpec((tb, arr.shape[1]), lambda b: (b, 0))
        return pl.BlockSpec((tb,) + arr.shape[1:], lambda b: (b, 0, 0))

    def _const_spec(arr):
        nd = arr.ndim
        return pl.BlockSpec(arr.shape, lambda b, _nd=nd: (0,) * _nd)

    args, in_specs = [], []
    for m, x in zip(masks, dense_xs):
        args += [m, x]
        in_specs += [_batched_spec(m), _batched_spec(x)]
    for p in (w1, b1, w2, b2):
        args.append(p)
        in_specs.append(_const_spec(p))

    # Advisory cost estimate so XLA schedules the surrounding ops around the
    # custom call instead of serializing.
    sum_n = sum(int(x.shape[1]) for x in dense_xs)
    flops = 2 * bp * (sum_n * H + 3 * H * FH + 3 * FH * out_pad)
    bytes_accessed = (sum(int(a.size) * a.dtype.itemsize for a in args)
                      + bp * out_pad * 4)
    cost = pl.CostEstimate(flops=flops, transcendentals=0,
                           bytes_accessed=bytes_accessed)

    cp_kwargs = dict(dimension_semantics=("parallel",))
    if vmem_limit_bytes is not None:
        cp_kwargs["vmem_limit_bytes"] = vmem_limit_bytes

    out = pl.pallas_call(
        _tgaa_head_kernel,
        out_shape=jax.ShapeDtypeStruct((bp, out_pad), jnp.float32),
        grid=grid,
        in_specs=in_specs,
        out_specs=pl.BlockSpec((tb, out_pad), lambda b: (b, 0)),
        compiler_params=pltpu.CompilerParams(**cp_kwargs),
        cost_estimate=cost,
    )(*args)
    return out[:B, :out_size]


def get_dense_x(x, batch_idx, pos_idx, batch_size, max_num):
    """JAX glue equivalent of get_dense_x: scatter flat per-cell features into
    a dense (B, max_num, H) tensor at positions given by x_idx."""
    H = x.shape[-1]
    dense = jnp.zeros((batch_size, max_num, H), x.dtype)
    return dense.at[batch_idx, pos_idx].set(x)


if __name__ == "__main__":
    key = jax.random.PRNGKey(0)
    keys = iter(jax.random.split(key, 16))

    B = 2                 # num_complexes (batch size)
    H = 32                # hidden
    FH = 2 * H            # final_hidden_multiplier * hidden
    OUT = 10              # out_size
    max_nums = (16, 24, 8)                  # max cells per dim (node/edge/2-cell)
    counts = [(12, 16), (18, 24), (5, 8)]   # actual cell counts per complex

    masks, dense_xs = [], []
    for N, cnt in zip(max_nums, counts):
        total = sum(cnt)
        # Flat per-cell features (stand-in for the output of the conv stack).
        x = jax.random.normal(next(keys), (total, H), jnp.float32)
        batch_idx = jnp.concatenate(
            [jnp.full((c,), b, jnp.int32) for b, c in enumerate(cnt)])
        pos_idx = jnp.concatenate(
            [jnp.arange(c, dtype=jnp.int32) for c in cnt])
        # x_mask construction (as in init_cells_to_dense_gcnc)
        mask = jnp.zeros((B, N), jnp.float32).at[batch_idx, pos_idx].set(1.0)
        masks.append(mask)
        dense_xs.append(get_dense_x(x, batch_idx, pos_idx, B, N))

    # Deterministic parameter init (shapes from the module's __init__):
    #   lin1s[i]: Linear(hidden, final_hidden_multiplier*hidden)
    #   lin2   : Linear(final_hidden_multiplier*hidden*(max_dim+1), out_size)
    lin1_ws = [0.1 * jax.random.normal(next(keys), (H, FH), jnp.float32)
               for _ in range(3)]
    lin1_bs = [0.1 * jax.random.normal(next(keys), (FH,), jnp.float32)
               for _ in range(3)]
    lin2_w = 0.1 * jax.random.normal(next(keys), (3 * FH, OUT), jnp.float32)
    lin2_b = 0.1 * jax.random.normal(next(keys), (OUT,), jnp.float32)

    # Pure-JAX reference of the same forward tail (masked-sum readout + MLP).
    ref_parts = []
    for i in range(3):
        pooled = jnp.matmul(masks[i][:, None, :], dense_xs[i])[:, 0, :]
        ref_parts.append(jnp.maximum(pooled @ lin1_ws[i] + lin1_bs[i], 0.0))
    ref = jnp.concatenate(ref_parts, axis=-1) @ lin2_w + lin2_b

    # ---------------- f32 path: tight numerical check -------------------------
    packed_f32 = pack_tgaa_head_params(lin1_ws, lin1_bs, lin2_w, lin2_b,
                                       param_dtype=jnp.float32)
    out_f32 = jax.block_until_ready(
        tgaa_readout_head(masks, dense_xs, packed_f32))
    assert out_f32.shape == (B, OUT)
    assert jnp.allclose(out_f32, ref, atol=2e-3, rtol=2e-3), "f32 mismatch"

    # ------------- bf16 path: production DMA-byte configuration ---------------
    masks_bf = [m.astype(jnp.bfloat16) for m in masks]
    dense_bf = [x.astype(jnp.bfloat16) for x in dense_xs]
    packed_bf = pack_tgaa_head_params(lin1_ws, lin1_bs, lin2_w, lin2_b,
                                      param_dtype=jnp.bfloat16)
    out_bf = jax.block_until_ready(
        tgaa_readout_head(masks_bf, dense_bf, packed_bf))
    assert out_bf.shape == (B, OUT)

    # Reference with the same dtype flow (bf16 storage, f32 accumulation).
    ref_parts_bf = []
    for i in range(3):
        m = masks_bf[i].astype(jnp.float32)
        x = dense_bf[i].astype(jnp.float32)
        pooled = jnp.sum(x * m[:, :, None], axis=1).astype(jnp.bfloat16)
        h = jnp.dot(pooled, lin1_ws[i].astype(jnp.bfloat16),
                    preferred_element_type=jnp.float32)
        h = jnp.maximum(
            h + lin1_bs[i].astype(jnp.bfloat16).astype(jnp.float32), 0.0)
        ref_parts_bf.append(h)
    h_cat = jnp.concatenate(ref_parts_bf, axis=-1).astype(jnp.bfloat16)
    ref_bf = (jnp.dot(h_cat, lin2_w.astype(jnp.bfloat16),
                      preferred_element_type=jnp.float32)
              + lin2_b.astype(jnp.bfloat16).astype(jnp.float32))
    assert jnp.allclose(out_bf, ref_bf, atol=3e-2, rtol=3e-2), "bf16 mismatch"

    print("KERNEL_OK")
</pallas_src>

<mosaic_0001>
module attributes {stable_mosaic.version = 11 : i64} {
  func.func @_tgaa_head_kernel(%arg0: i32, %arg1: memref<2x16xf32, #tpu.memory_space<vmem>>, %arg2: memref<2x16x32xf32, #tpu.memory_space<vmem>>, %arg3: memref<2x24xf32, #tpu.memory_space<vmem>>, %arg4: memref<2x24x32xf32, #tpu.memory_space<vmem>>, %arg5: memref<2x8xf32, #tpu.memory_space<vmem>>, %arg6: memref<2x8x32xf32, #tpu.memory_space<vmem>>, %arg7: memref<3x32x64xf32, #tpu.memory_space<vmem>>, %arg8: memref<3x64xf32, #tpu.memory_space<vmem>>, %arg9: memref<3x64x128xf32, #tpu.memory_space<vmem>>, %arg10: memref<1x128xf32, #tpu.memory_space<vmem>>, %arg11: memref<2x128xf32, #tpu.memory_space<vmem>>) attributes {dimension_semantics = [#tpu.dimension_semantics<parallel>], iteration_bounds = array<i64: 1>, scalar_prefetch = 0 : i64, scratch_operands = 0 : i64, tpu.core_type = #tpu.core_type<tc>, window_params = [{transform_indices = @transform_0, window_bounds = array<i64: 2, 16>}, {transform_indices = @transform_1, window_bounds = array<i64: 2, 16, 32>}, {transform_indices = @transform_2, window_bounds = array<i64: 2, 24>}, {transform_indices = @transform_3, window_bounds = array<i64: 2, 24, 32>}, {transform_indices = @transform_4, window_bounds = array<i64: 2, 8>}, {transform_indices = @transform_5, window_bounds = array<i64: 2, 8, 32>}, {pipeline_mode = #tpu.pipeline_mode<synchronous>, transform_indices = @transform_6, window_bounds = array<i64: 3, 32, 64>}, {pipeline_mode = #tpu.pipeline_mode<synchronous>, transform_indices = @transform_7, window_bounds = array<i64: 3, 64>}, {pipeline_mode = #tpu.pipeline_mode<synchronous>, transform_indices = @transform_8, window_bounds = array<i64: 3, 64, 128>}, {pipeline_mode = #tpu.pipeline_mode<synchronous>, transform_indices = @transform_9, window_bounds = array<i64: 1, 128>}, {transform_indices = @transform_10, window_bounds = array<i64: 2, 128>}]} {
    %c0 = arith.constant 0 : index
    %c0_0 = arith.constant 0 : index
    %0 = vector.load %arg1[%c0, %c0_0] : memref<2x16xf32, #tpu.memory_space<vmem>>, vector<2x16xf32>
    %c0_1 = arith.constant 0 : index
    %c0_2 = arith.constant 0 : index
    %c0_3 = arith.constant 0 : index
    %1 = vector.load %arg2[%c0_1, %c0_2, %c0_3] : memref<2x16x32xf32, #tpu.memory_space<vmem>>, vector<2x16x32xf32>
    %2 = vector.shape_cast %0 : vector<2x16xf32> to vector<2x16x1xf32>
    %3 = vector.broadcast %2 : vector<2x16x1xf32> to vector<2x16x32xf32>
    %4 = arith.mulf %1, %3 : vector<2x16x32xf32>
    %cst = arith.constant dense<0.000000e+00> : vector<2x32xf32>
    %5 = vector.multi_reduction <add>, %4, %cst [1] : vector<2x16x32xf32> to vector<2x32xf32>
    %c0_4 = arith.constant 0 : index
    %c0_5 = arith.constant 0 : index
    %c0_6 = arith.constant 0 : index
    %6 = vector.load %arg7[%c0_4, %c0_5, %c0_6] : memref<3x32x64xf32, #tpu.memory_space<vmem>>, vector<1x32x64xf32>
    %7 = vector.shape_cast %6 : vector<1x32x64xf32> to vector<32x64xf32>
    %cst_7 = arith.constant dense<0.000000e+00> : vector<2x64xf32>
    %8 = tpu.matmul %5, %7, %cst_7 {dimension_numbers = #tpu.dot_dimension_numbers<[1], [0], [0], [1], [0, 0, 1, 1], [], []>} : vector<2x32xf32>, vector<32x64xf32>, vector<2x64xf32> -> vector<2x64xf32>
    %c0_8 = arith.constant 0 : index
    %c0_9 = arith.constant 0 : index
    %9 = vector.load %arg8[%c0_8, %c0_9] : memref<3x64xf32, #tpu.memory_space<vmem>>, vector<1x64xf32>
    %10 = vector.shape_cast %9 : vector<1x64xf32> to vector<64xf32>
    %11 = vector.shape_cast %10 : vector<64xf32> to vector<1x64xf32>
    %12 = vector.broadcast %11 : vector<1x64xf32> to vector<2x64xf32>
    %13 = arith.addf %8, %12 : vector<2x64xf32>
    %cst_10 = arith.constant 0.000000e+00 : f32
    %14 = vector.broadcast %cst_10 : f32 to vector<2x64xf32>
    %15 = arith.maximumf %13, %14 : vector<2x64xf32>
    %c0_11 = arith.constant 0 : index
    %c0_12 = arith.constant 0 : index
    %c0_13 = arith.constant 0 : index
    %16 = vector.load %arg9[%c0_11, %c0_12, %c0_13] : memref<3x64x128xf32, #tpu.memory_space<vmem>>, vector<1x64x128xf32>
    %17 = vector.shape_cast %16 : vector<1x64x128xf32> to vector<64x128xf32>
    %cst_14 = arith.constant dense<0.000000e+00> : vector<2x128xf32>
    %18 = tpu.matmul %15, %17, %cst_14 {dimension_numbers = #tpu.dot_dimension_numbers<[1], [0], [0], [1], [0, 0, 1, 1], [], []>} : vector<2x64xf32>, vector<64x128xf32>, vector<2x128xf32> -> vector<2x128xf32>
    %c0_15 = arith.constant 0 : index
    %c0_16 = arith.constant 0 : index
    %19 = vector.load %arg3[%c0_15, %c0_16] : memref<2x24xf32, #tpu.memory_space<vmem>>, vector<2x24xf32>
    %c0_17 = arith.constant 0 : index
    %c0_18 = arith.constant 0 : index
    %c0_19 = arith.constant 0 : index
    %20 = vector.load %arg4[%c0_17, %c0_18, %c0_19] : memref<2x24x32xf32, #tpu.memory_space<vmem>>, vector<2x24x32xf32>
    %21 = vector.shape_cast %19 : vector<2x24xf32> to vector<2x24x1xf32>
    %22 = vector.broadcast %21 : vector<2x24x1xf32> to vector<2x24x32xf32>
    %23 = arith.mulf %20, %22 : vector<2x24x32xf32>
    %cst_20 = arith.constant dense<0.000000e+00> : vector<2x32xf32>
    %24 = vector.multi_reduction <add>, %23, %cst_20 [1] : vector<2x24x32xf32> to vector<2x32xf32>
    %c1 = arith.constant 1 : index
    %c0_21 = arith.constant 0 : index
    %c0_22 = arith.constant 0 : index
    %25 = vector.load %arg7[%c1, %c0_21, %c0_22] : memref<3x32x64xf32, #tpu.memory_space<vmem>>, vector<1x32x64xf32>
    %26 = vector.shape_cast %25 : vector<1x32x64xf32> to vector<32x64xf32>
    %cst_23 = arith.constant dense<0.000000e+00> : vector<2x64xf32>
    %27 = tpu.matmul %24, %26, %cst_23 {dimension_numbers = #tpu.dot_dimension_numbers<[1], [0], [0], [1], [0, 0, 1, 1], [], []>} : vector<2x32xf32>, vector<32x64xf32>, vector<2x64xf32> -> vector<2x64xf32>
    %c1_24 = arith.constant 1 : index
    %c0_25 = arith.constant 0 : index
    %28 = vector.load %arg8[%c1_24, %c0_25] : memref<3x64xf32, #tpu.memory_space<vmem>>, vector<1x64xf32>
    %29 = vector.shape_cast %28 : vector<1x64xf32> to vector<64xf32>
    %30 = vector.shape_cast %29 : vector<64xf32> to vector<1x64xf32>
    %31 = vector.broadcast %30 : vector<1x64xf32> to vector<2x64xf32>
    %32 = arith.addf %27, %31 : vector<2x64xf32>
    %cst_26 = arith.constant 0.000000e+00 : f32
    %33 = vector.broadcast %cst_26 : f32 to vector<2x64xf32>
    %34 = arith.maximumf %32, %33 : vector<2x64xf32>
    %c1_27 = arith.constant 1 : index
    %c0_28 = arith.constant 0 : index
    %c0_29 = arith.constant 0 : index
    %35 = vector.load %arg9[%c1_27, %c0_28, %c0_29] : memref<3x64x128xf32, #tpu.memory_space<vmem>>, vector<1x64x128xf32>
    %36 = vector.shape_cast %35 : vector<1x64x128xf32> to vector<64x128xf32>
    %cst_30 = arith.constant dense<0.000000e+00> : vector<2x128xf32>
    %37 = tpu.matmul %34, %36, %cst_30 {dimension_numbers = #tpu.dot_dimension_numbers<[1], [0], [0], [1], [0, 0, 1, 1], [], []>} : vector<2x64xf32>, vector<64x128xf32>, vector<2x128xf32> -> vector<2x128xf32>
    %38 = arith.addf %18, %37 : vector<2x128xf32>
    %c0_31 = arith.constant 0 : index
    %c0_32 = arith.constant 0 : index
    %39 = vector.load %arg5[%c0_31, %c0_32] : memref<2x8xf32, #tpu.memory_space<vmem>>, vector<2x8xf32>
    %c0_33 = arith.constant 0 : index
    %c0_34 = arith.constant 0 : index
    %c0_35 = arith.constant 0 : index
    %40 = vector.load %arg6[%c0_33, %c0_34, %c0_35] : memref<2x8x32xf32, #tpu.memory_space<vmem>>, vector<2x8x32xf32>
    %41 = vector.shape_cast %39 : vector<2x8xf32> to vector<2x8x1xf32>
    %42 = vector.broadcast %41 : vector<2x8x1xf32> to vector<2x8x32xf32>
    %43 = arith.mulf %40, %42 : vector<2x8x32xf32>
    %cst_36 = arith.constant dense<0.000000e+00> : vector<2x32xf32>
    %44 = vector.multi_reduction <add>, %43, %cst_36 [1] : vector<2x8x32xf32> to vector<2x32xf32>
    %c2 = arith.constant 2 : index
    %c0_37 = arith.constant 0 : index
    %c0_38 = arith.constant 0 : index
    %45 = vector.load %arg7[%c2, %c0_37, %c0_38] : memref<3x32x64xf32, #tpu.memory_space<vmem>>, vector<1x32x64xf32>
    %46 = vector.shape_cast %45 : vector<1x32x64xf32> to vector<32x64xf32>
    %cst_39 = arith.constant dense<0.000000e+00> : vector<2x64xf32>
    %47 = tpu.matmul %44, %46, %cst_39 {dimension_numbers = #tpu.dot_dimension_numbers<[1], [0], [0], [1], [0, 0, 1, 1], [], []>} : vector<2x32xf32>, vector<32x64xf32>, vector<2x64xf32> -> vector<2x64xf32>
    %c2_40 = arith.constant 2 : index
    %c0_41 = arith.constant 0 : index
    %48 = vector.load %arg8[%c2_40, %c0_41] : memref<3x64xf32, #tpu.memory_space<vmem>>, vector<1x64xf32>
    %49 = vector.shape_cast %48 : vector<1x64xf32> to vector<64xf32>
    %50 = vector.shape_cast %49 : vector<64xf32> to vector<1x64xf32>
    %51 = vector.broadcast %50 : vector<1x64xf32> to vector<2x64xf32>
    %52 = arith.addf %47, %51 : vector<2x64xf32>
    %cst_42 = arith.constant 0.000000e+00 : f32
    %53 = vector.broadcast %cst_42 : f32 to vector<2x64xf32>
    %54 = arith.maximumf %52, %53 : vector<2x64xf32>
    %c2_43 = arith.constant 2 : index
    %c0_44 = arith.constant 0 : index
    %c0_45 = arith.constant 0 : index
    %55 = vector.load %arg9[%c2_43, %c0_44, %c0_45] : memref<3x64x128xf32, #tpu.memory_space<vmem>>, vector<1x64x128xf32>
    %56 = vector.shape_cast %55 : vector<1x64x128xf32> to vector<64x128xf32>
    %cst_46 = arith.constant dense<0.000000e+00> : vector<2x128xf32>
    %57 = tpu.matmul %54, %56, %cst_46 {dimension_numbers = #tpu.dot_dimension_numbers<[1], [0], [0], [1], [0, 0, 1, 1], [], []>} : vector<2x64xf32>, vector<64x128xf32>, vector<2x128xf32> -> vector<2x128xf32>
    %58 = arith.addf %38, %57 : vector<2x128xf32>
    %c0_47 = arith.constant 0 : index
    %c0_48 = arith.constant 0 : index
    %59 = vector.load %arg10[%c0_47, %c0_48] : memref<1x128xf32, #tpu.memory_space<vmem>>, vector<1x128xf32>
    %60 = vector.broadcast %59 : vector<1x128xf32> to vector<2x128xf32>
    %61 = arith.addf %58, %60 : vector<2x128xf32>
    %c0_49 = arith.constant 0 : index
    %c0_50 = arith.constant 0 : index
    %62 = vector.load %arg11[%c0_49, %c0_50] : memref<2x128xf32, #tpu.memory_space<vmem>>, vector<2x128xf32>
    tpu.vector_store %arg11[%c0_49, %c0_50], %61 {strides = array<i32>} : memref<2x128xf32, #tpu.memory_space<vmem>>, vector<2x128xf32>,
    return
  }
  func.func @transform_0(%arg0: i32) -> (i32, i32) {
    %c0_i32 = arith.constant 0 : i32
    %c0_i32_0 = arith.constant 0 : i32
    return %arg0, %c0_i32 : i32, i32
  }
  func.func @transform_1(%arg0: i32) -> (i32, i32, i32) {
    %c0_i32 = arith.constant 0 : i32
    %c0_i32_0 = arith.constant 0 : i32
    %c0_i32_1 = arith.constant 0 : i32
    return %arg0, %c0_i32, %c0_i32_0 : i32, i32, i32
  }
  func.func @transform_2(%arg0: i32) -> (i32, i32) {
    %c0_i32 = arith.constant 0 : i32
    %c0_i32_0 = arith.constant 0 : i32
    return %arg0, %c0_i32 : i32, i32
  }
  func.func @transform_3(%arg0: i32) -> (i32, i32, i32) {
    %c0_i32 = arith.constant 0 : i32
    %c0_i32_0 = arith.constant 0 : i32
    %c0_i32_1 = arith.constant 0 : i32
    return %arg0, %c0_i32, %c0_i32_0 : i32, i32, i32
  }
  func.func @transform_4(%arg0: i32) -> (i32, i32) {
    %c0_i32 = arith.constant 0 : i32
    %c0_i32_0 = arith.constant 0 : i32
    return %arg0, %c0_i32 : i32, i32
  }
  func.func @transform_5(%arg0: i32) -> (i32, i32, i32) {
    %c0_i32 = arith.constant 0 : i32
    %c0_i32_0 = arith.constant 0 : i32
    %c0_i32_1 = arith.constant 0 : i32
    return %arg0, %c0_i32, %c0_i32_0 : i32, i32, i32
  }
  func.func @transform_6(%arg0: i32) -> (i32, i32, i32) {
    %c0_i32 = arith.constant 0 : i32
    %c0_i32_0 = arith.constant 0 : i32
    %c0_i32_1 = arith.constant 0 : i32
    %c0_i32_2 = arith.constant 0 : i32
    return %c0_i32, %c0_i32_0, %c0_i32_1 : i32, i32, i32
  }
  func.func @transform_7(%arg0: i32) -> (i32, i32) {
    %c0_i32 = arith.constant 0 : i32
    %c0_i32_0 = arith.constant 0 : i32
    %c0_i32_1 = arith.constant 0 : i32
    return %c0_i32, %c0_i32_0 : i32, i32
  }
  func.func @transform_8(%arg0: i32) -> (i32, i32, i32) {
    %c0_i32 = arith.constant 0 : i32
    %c0_i32_0 = arith.constant 0 : i32
    %c0_i32_1 = arith.constant 0 : i32
    %c0_i32_2 = arith.constant 0 : i32
    return %c0_i32, %c0_i32_0, %c0_i32_1 : i32, i32, i32
  }
  func.func @transform_9(%arg0: i32) -> (i32, i32) {
    %c0_i32 = arith.constant 0 : i32
    %c0_i32_0 = arith.constant 0 : i32
    %c0_i32_1 = arith.constant 0 : i32
    return %c0_i32, %c0_i32_0 : i32, i32
  }
  func.func @transform_10(%arg0: i32) -> (i32, i32) {
    %c0_i32 = arith.constant 0 : i32
    %c0_i32_0 = arith.constant 0 : i32
    return %arg0, %c0_i32 : i32, i32
  }
}

</mosaic_0001>

<bundles_post_ra>
// kernel: tpu_custom_call.1
= control target key start
LH: loop header
LB: loop body
LE: loop exit
PB: predicated region body
PF: predicated region fallthrough
CT: control target
= control target key end

     0   :  { %15 = vsyncpa [#allocation3], 0  ;;  %s1401_s0 = inlined_call_operand.hbm [shape: f32[2,16], index: 0, kind: input, shape index: {}]   ;;  %s1402_s1 = inlined_call_operand.hbm [shape: f32[2,16,32], index: 1, kind: input, shape index: {}]   ;;  %s1403_s2 = inlined_call_operand.vmem [shape: f32[2,24], index: 2, kind: input, shape index: {}]   ;;  %s1404_s3 = inlined_call_operand.hbm [shape: f32[2,24,32], index: 3, kind: input, shape index: {}]   ;;  %s1405_s4 = inlined_call_operand.hbm [shape: f32[2,8], index: 4, kind: input, shape index: {}]   ;;  %s1406_s5 = inlined_call_operand.vmem [shape: f32[2,8,32], index: 5, kind: input, shape index: {}]   ;;  %s1407_s6 = inlined_call_operand.hbm [shape: f32[3,32,64], index: 6, kind: input, shape index: {}]   ;;  %s1408_s7 = inlined_call_operand.vmem [shape: f32[3,64], index: 7, kind: input, shape index: {}]   ;;  %s1409_s8 = inlined_call_operand.hbm [shape: f32[3,64,128], index: 8, kind: input, shape index: {}]   ;;  %s1410_s9 = inlined_call_operand.vmem [shape: f32[1,128], index: 9, kind: input, shape index: {}]   ;;  %s1411_s10 = inlined_call_operand.hbm [shape: f32[2,128], index: 10, kind: output, shape index: {}]  }
   0x1   :  { %16 = vsyncpa [#allocation6], 0 }
   0x2   :  { %17 = vsyncpa [#allocation9], 0 }
   0x3   :  { %18 = vsyncpa [#allocation12], 0 }
   0x4   :  { %19 = vsyncpa [#allocation4], 0  ;;  %s1166_s13 = smov [#allocation5]   ;;  %s1002_s17 = scalar_lea.hbm %s1402_s1, 512 }
   0x5   :  { %s35_s14 = sshll.u32 %s1166_s13, 4  ;;  %p1003_p0 = scmp.ne.s32.totalorder %s1402_s1, %s1002_s17  ;;  %s36_s14 = int_to_ptr.vmem [resolvable:$true] %s35_s14 }
   0x6   :  { %p1006_p1 = scmp.lt.u32.totalorder %s1002_s17, %s1402_s1 }
   0x8   :  { %p1008_p2 = pnand %p1006_p1, %p1003_p0 }
   0xa   :  { %1011 = shalt.err (!%p1008_p2)
}
   0xb   :  { %s1012_s22 = scalar_lea.vmem %s36_s14, 512  ;;  %p1017_p4 = scmp.lt.s32.totalorder %s36_s14, %s36_s14 }
   0xc   :  { %p1013_p3 = scmp.ne.s32.totalorder %s36_s14, %s1012_s22  ;;  %p1018_p5 = scmp.lt.s32.totalorder %s1012_s22, %s1012_s22 }
   0xe   :  { %p1019_p6 = por %p1018_p5, %p1017_p4 }
  0x10   :  { %p1020_p7 = pnand %p1019_p6, %p1013_p3 }
  0x12   :  { %1023 = shalt.err (!%p1020_p7)
}
  0x13   :  { %s1167_s23 = smov 128   ;;  %s1168_s24 = smov 8  }
  0x14   :  { %41 = dma.hbm_to_vmem [thread:$0]  %s1402_s1, 512, %s36_s14, [#allocation6], %s1167_s23, %s1167_s23, %s1168_s24  }
  0x15   :  { %s1169_s27 = smov [#allocation8]   ;;  %s1170_s29 = smov [#allocation2]  }
  0x16   :  { %s62_s28 = sshll.u32 %s1169_s27, 4  ;;  %s26_s30 = sshll.u32 %s1170_s29, 4  ;;  %s63_s28 = int_to_ptr.vmem [resolvable:$true] %s62_s28  ;;  %s27_s30 = int_to_ptr.vmem [resolvable:$true] %s26_s30 }
  0x17   :  { %s1024_s13 = scalar_lea.hbm %s1405_s4, 32 }
  0x18   :  { %p1025_p8 = scmp.ne.s32.totalorder %s1405_s4, %s1024_s13  ;;  %p1028_p9 = scmp.lt.u32.totalorder %s1024_s13, %s1405_s4 }
  0x1a   :  { %p1030_p10 = pnand %p1028_p9, %p1025_p8 }
  0x1c   :  { %1033 = shalt.err (!%p1030_p10)
}
  0x1d   :  { %s1034_s1 = scalar_lea.vmem %s63_s28, 32  ;;  %p1039_p12 = scmp.lt.s32.totalorder %s63_s28, %s63_s28 }
  0x1e   :  { %p1035_p11 = scmp.ne.s32.totalorder %s63_s28, %s1034_s1  ;;  %p1040_p13 = scmp.lt.s32.totalorder %s1034_s1, %s1034_s1 }
  0x20   :  { %p1041_p0 = por %p1040_p13, %p1039_p12 }
  0x22   :  { %p1042_p1 = pnand %p1041_p0, %p1035_p11 }
  0x24   :  { %1045 = shalt.err (!%p1042_p1)
}
  0x25   :  { %65 = dma.hbm_to_vmem [thread:$0]  %s1405_s4, 32, %s63_s28, [#allocation9]  }
  0x26   :  { %s1046_s22 = scalar_lea.hbm %s1401_s0, 32 }
  0x27   :  { %p1047_p2 = scmp.ne.s32.totalorder %s1401_s0, %s1046_s22  ;;  %p1050_p3 = scmp.lt.u32.totalorder %s1046_s22, %s1401_s0 }
  0x29   :  { %p1052_p4 = pnand %p1050_p3, %p1047_p2 }
  0x2b   :  { %1055 = shalt.err (!%p1052_p4)
}
  0x2c   :  { %s1056_s11 = scalar_lea.vmem %s27_s30, 32  ;;  %p1061_p6 = scmp.lt.s32.totalorder %s27_s30, %s27_s30 }
  0x2d   :  { %p1057_p5 = scmp.ne.s32.totalorder %s27_s30, %s1056_s11  ;;  %p1062_p7 = scmp.lt.s32.totalorder %s1056_s11, %s1056_s11 }
  0x2f   :  { %p1063_p8 = por %p1062_p7, %p1061_p6 }
  0x31   :  { %p1064_p9 = pnand %p1063_p8, %p1057_p5 }
  0x33   :  { %1067 = shalt.err (!%p1064_p9)
}
  0x34   :  { %29 = dma.hbm_to_vmem [thread:$0]  %s1401_s0, 32, %s27_s30, [#allocation3]  }
  0x35   :  { %s1171_s12 = smov [#allocation7]   ;;  %s1172_s15 = smov [#allocation10]  }
  0x36   :  { %s49_s13 = sshll.u32 %s1171_s12, 4  ;;  %s73_s16 = sshll.u32 %s1172_s15, 4  ;;  %s50_s13 = int_to_ptr.vmem [resolvable:$true] %s49_s13  ;;  %s74_s16 = int_to_ptr.vmem [resolvable:$true] %s73_s16 }
  0x37   :  { %s1068_s1 = scalar_lea.hbm %s1404_s3, 768 }
  0x38   :  { %p1069_p10 = scmp.ne.s32.totalorder %s1404_s3, %s1068_s1  ;;  %p1072_p11 = scmp.lt.u32.totalorder %s1068_s1, %s1404_s3 }
  0x3a   :  { %p1074_p12 = pnand %p1072_p11, %p1069_p10 }
  0x3c   :  { %1077 = shalt.err (!%p1074_p12)
}
  0x3d   :  { %s1078_s0 = scalar_lea.vmem %s50_s13, 768  ;;  %p1083_p0 = scmp.lt.s32.totalorder %s50_s13, %s50_s13 }
  0x3e   :  { %p1079_p13 = scmp.ne.s32.totalorder %s50_s13, %s1078_s0  ;;  %p1084_p1 = scmp.lt.s32.totalorder %s1078_s0, %s1078_s0 }
  0x40   :  { %p1085_p2 = por %p1084_p1, %p1083_p0 }
  0x42   :  { %p1086_p3 = pnand %p1085_p2, %p1079_p13 }
  0x44   :  { %1089 = shalt.err (!%p1086_p3)
}
  0x45   :  { %55 = dma.hbm_to_vmem [thread:$0]  %s1404_s3, 768, %s50_s13, [#allocation6], %s1167_s23, %s1167_s23, %s1168_s24  }
  0x46   :  { %s1090_s27 = scalar_lea.hbm %s1407_s6, 1536 }
  0x47   :  { %p1091_p4 = scmp.ne.s32.totalorder %s1407_s6, %s1090_s27  ;;  %p1094_p5 = scmp.lt.u32.totalorder %s1090_s27, %s1407_s6 }
  0x49   :  { %p1096_p6 = pnand %p1094_p5, %p1091_p4 }
  0x4b   :  { %1099 = shalt.err (!%p1096_p6)
}
  0x4c   :  { %s1100_s12 = scalar_lea.vmem %s74_s16, 1536  ;;  %p1105_p8 = scmp.lt.s32.totalorder %s74_s16, %s74_s16 }
  0x4d   :  { %p1101_p7 = scmp.ne.s32.totalorder %s74_s16, %s1100_s12  ;;  %p1106_p9 = scmp.lt.s32.totalorder %s1100_s12, %s1100_s12 }
  0x4f   :  { %p1107_p10 = por %p1106_p9, %p1105_p8 }
  0x51   :  { %p1108_p11 = pnand %p1107_p10, %p1101_p7 }
  0x53   :  { %1111 = shalt.err (!%p1108_p11)
}
  0x54   :  { %79 = dma.hbm_to_vmem [thread:$0]  %s1407_s6, 1536, %s74_s16, [#allocation9], %s1167_s23, %s1167_s23, %s1168_s24  }
  0x55   :  { %s1173_s15 = smov [#allocation11]   ;;  %s1112_s14 = scalar_lea.hbm %s1409_s8, 3072 }
  0x56   :  { %s87_s17 = sshll.u32 %s1173_s15, 4  ;;  %p1113_p12 = scmp.ne.s32.totalorder %s1409_s8, %s1112_s14  ;;  %s88_s17 = int_to_ptr.vmem [resolvable:$true] %s87_s17 }
  0x57   :  { %p1116_p13 = scmp.lt.u32.totalorder %s1112_s14, %s1409_s8 }
  0x59   :  { %p1118_p0 = pnand %p1116_p13, %p1113_p12 }
  0x5b   :  { %1121 = shalt.err (!%p1118_p0)
}
  0x5c   :  { %s1122_s30 = scalar_lea.vmem %s88_s17, 3072  ;;  %p1127_p2 = scmp.lt.s32.totalorder %s88_s17, %s88_s17 }
  0x5d   :  { %p1123_p1 = scmp.ne.s32.totalorder %s88_s17, %s1122_s30  ;;  %p1128_p3 = scmp.lt.s32.totalorder %s1122_s30, %s1122_s30 }
  0x5f   :  { %p1129_p4 = por %p1128_p3, %p1127_p2 }
  0x61   :  { %p1130_p5 = pnand %p1129_p4, %p1123_p1 }
  0x63   :  { %1133 = shalt.err (!%p1130_p5)
}
  0x64   :  { %93 = dma.hbm_to_vmem [thread:$0]  %s1409_s8, 3072, %s88_s17, [#allocation12], %s1167_s23, %s1167_s23, %s1168_s24  }
  0x65   :  { %1156 = dma.done.wait [#allocation3], 32  }
  0x66   :  { %1157 = vsyncadd [#allocation3], 4294967264 }
  0x67   :  { %1158 = dma.done.wait [#allocation6], 1280  }
  0x68   :  { %1159 = vsyncadd [#allocation6], 4294966016 }
  0x69   :  { %1160 = dma.done.wait [#allocation9], 1568  }
  0x6a   :  { %1161 = vsyncadd [#allocation9], 4294965728 }
  0x6b   :  { %1162 = dma.done.wait [#allocation12], 3072  }
  0x6c   :  { %1163 = vsyncadd [#allocation12], 4294964224  ;;  %v119_v0 = vlaneseq  ;;  %v258_v4 = vld [vmem:[%s1403_s2] sm:$0x3]  ;;  %v324_v7 = vld [vmem:[#allocation10 + $0x20] sm:$0xff]  ;;  %v1174_v11 = vmov 0.0|0.0  }
  0x6d   :  { %v325_v8 = vld [vmem:[#allocation10 + $0x28] sm:$0xff]  ;;  %942 = vmatprep.subr.bf16.mxu1 %v1174_v11  ;;  %936 = vmatprep.subr.bf16.mxu0 %v1174_v11  ;;  %v326_v12 = vld [vmem:[#allocation10 + $0x30] sm:$0xff]  ;;  %v327_v13 = vld [vmem:[#allocation10 + $0x38] sm:$0xff]  ;;  %vm1175_vm0 = vmmov 0   ;;  %v1176_v20 = vmov 0.0   ;;  %vm145_vm1 = vcmask 261120  }
  0x6e   :  { %v120_v1 = vshrl.u32 %v119_v0, 7  ;;  %v943_v9 = vpack.c.bf16 %v325_v8, %v324_v7  ;;  %v114_v10 = vld [vmem:[#allocation2] sm:$0x3]  ;;  %v946_v15 = vpack.c.bf16 %v327_v13, %v326_v12  ;;  %v164_v16 = vld [vmem:[#allocation10] sm:$0xff]  ;;  %865 = vmatprep.mubr.msk.f32.mxu1 %vm1175_vm0, %v1176_v20  ;;  %854 = vmatprep.mubr.msk.f32.mxu0 %vm1175_vm0, %v1176_v20  ;;  %v166_v21 = vld [vmem:[#allocation10 + $0x10] sm:$0xff]  ;;  %vm175_vm2 = vcmask 1041409  }
  0x6f   :  { %v165_v17 = vld [vmem:[#allocation10 + $0x8] sm:$0xff]  ;;  %v167_v22 = vld [vmem:[#allocation10 + $0x18] sm:$0xff]  ;;  %vm418_vm3 = vcmask 523264   ;;  %s1177_s3 = smov [#allocation13]  }
  0x70   :  { %v132_v2 = vsub.s32 1, %v120_v1  ;;  %v121_v3 = vsub.s32 0, %v120_v1  ;;  %944 = vmatpush3.bf16.msra.mxu1 %v943_v9  ;;  %v937_v19 = vpack.c.bf16 %v165_v17, %v164_v16  ;;  %v940_v23 = vpack.c.bf16 %v167_v22, %v166_v21  ;;  %v565_v24 = vld [vmem:[#allocation8] sm:$0x3]  ;;  %v262_v29 = vld [vmem:[#allocation7 + $0x18] sm:$0xff]  ;;  %v259_v30 = vld [vmem:[#allocation7] sm:$0xff] }
  0x71   :  { %945 = vmatprep.subr.bf16.mxu1 %v1174_v11  ;;  %v263_v31 = vld [vmem:[#allocation7 + $0x20] sm:$0xff]  ;;  %v260_v32 = vld [vmem:[#allocation7 + $0x8] sm:$0xff]  ;;  %v261_v40 = vld [vmem:[#allocation7 + $0x10] sm:$0xff]  ;;  %s782_s13 = sshll.u32 %s1177_s3, 4  ;;  %s783_s13 = int_to_ptr.vmem [resolvable:$true] %s782_s13 }
  0x72   :  { %v283_v5 = vrot.slane %v258_v4, %v132_v2  ;;  %v268_v6 = vrot.slane %v258_v4, %v121_v3  ;;  %v122_v14 = vrot.slane %v114_v10, %v121_v3  ;;  %v133_v18 = vrot.slane %v114_v10, %v132_v2  ;;  %938 = vmatpush3.bf16.msra.mxu0 %v937_v19  ;;  %v264_v39 = vld [vmem:[#allocation7 + $0x28] sm:$0xff]  ;;  %v115_v52 = vld [vmem:[#allocation5] sm:$0xff]  ;;  %v118_v63 = vld [vmem:[#allocation5 + $0x18] sm:$0xff]  ;;  %p1139_p7 = scmp.lt.s32.totalorder %s783_s13, %s783_s13 }
  0x73   :  { %939 = vmatprep.subr.bf16.mxu0 %v1174_v11  ;;  %v578_v25 = vrot.slane %v565_v24, %v132_v2  ;;  %v571_v26 = vrot.slane %v565_v24, %v121_v3  ;;  %v116_v51 = vld [vmem:[#allocation5 + $0x8] sm:$0xff]  ;;  %v117_v0 = vld [vmem:[#allocation5 + $0x10] sm:$0xff]  ;;  %v251_v22 = vld [vmem:[#allocation11 + $0x8] sm:$0xff] }
  0x74   :  { %285 = vbcast.lane.b32.xlu1 %v283_v5, 256  ;;  %270 = vbcast.lane.b32.xlu0 %v268_v6, 256  ;;  %v250_v21 = vld [vmem:[#allocation11] sm:$0xff] }
  0x75   :  { %947 = vmatpush3.bf16.msra.mxu1 %v946_v15 }
  0x76   :  { %960 = vmatprep.subr.bf16.mxu1 %v1174_v11  ;;  %941 = vmatpush3.bf16.msra.mxu0 %v940_v23 }
  0x77   :  { %948 = vmatprep.subr.bf16.mxu0 %v1174_v11 }
  0x78   :  { %289 = vbcast.lane.b32.xlu1 %v283_v5, 264  ;;  %274 = vbcast.lane.b32.xlu0 %v268_v6, 264 }
  0x7c   :  { %293 = vbcast.lane.b32.xlu1 %v283_v5, 272  ;;  %278 = vbcast.lane.b32.xlu0 %v268_v6, 272 }
  0x80   :  { %128 = vbcast.lane.b32.xlu1 %v122_v14, 264  ;;  %124 = vbcast.lane.b32.xlu0 %v122_v14, 256 }
  0x84   :  { %139 = vbcast.lane.b32.xlu1 %v133_v18, 264  ;;  %135 = vbcast.lane.b32.xlu0 %v133_v18, 256 }
  0x88   :  { %580 = vbcast.lane.b32.xlu1 %v578_v25, 256  ;;  %573 = vbcast.lane.b32.xlu0 %v571_v26, 256 }
  0xe6   :  { %v286_v27 = vpop.permute.xlu1 %285  ;;  %v271_v28 = vpop.permute.xlu0 %270 }
  0xe7   :  { %v298_v35 = vmul.f32 %v286_v27, %v262_v29  ;;  %v295_v36 = vmul.f32 %v271_v28, %v259_v30  ;;  %v961_v27 = vpack.c.bf16 %v251_v22, %v250_v21 }
  0xe9   :  { %v312_v45 = vsel %vm145_vm1, %v298_v35, 0.0  ;;  %v301_v46 = vsel %vm145_vm1, %v295_v36, 0.0  ;;  %v410_v36 = vld [vmem:[#allocation11 + $0x40] sm:$0xff] }
  0xea   :  { %v290_v33 = vpop.permute.xlu1 %289  ;;  %v275_v34 = vpop.permute.xlu0 %274 }
  0xeb   :  { %v299_v37 = vmul.f32 %v290_v33, %v263_v31  ;;  %v296_v38 = vmul.f32 %v275_v34, %v260_v32 }
  0xed   :  { %v313_v41 = vsel %vm145_vm1, %v299_v37, 0.0  ;;  %v302_v42 = vsel %vm145_vm1, %v296_v38, 0.0  ;;  %v411_v37 = vld [vmem:[#allocation11 + $0x48] sm:$0xff] }
  0xee   :  { %v294_v43 = vpop.permute.xlu1 %293  ;;  %v279_v44 = vpop.permute.xlu0 %278  ;;  %v314_v49 = vadd.f32 %v313_v41, %v312_v45  ;;  %v303_v50 = vadd.f32 %v302_v42, %v301_v46  ;;  %v949_v41 = vpack.c.bf16 %v411_v37, %v410_v36  ;;  %v412_v42 = vld [vmem:[#allocation11 + $0x50] sm:$0xff]  ;;  %v414_v46 = vld [vmem:[#allocation11 + $0x60] sm:$0xff] }
  0xef   :  { %v300_v47 = vmul.f32 %v294_v43, %v264_v39  ;;  %v297_v48 = vmul.f32 %v279_v44, %v261_v40  ;;  %v413_v43 = vld [vmem:[#allocation11 + $0x58] sm:$0xff] }
  0xf0   :  { %v952_v45 = vpack.c.bf16 %v413_v43, %v412_v42  ;;  %v689_v42 = vld [vmem:[#allocation11 + $0xa0] sm:$0xff]  ;;  %v690_v43 = vld [vmem:[#allocation11 + $0xa8] sm:$0xff] }
  0xf1   :  { %v315_v53 = vsel %vm145_vm1, %v300_v47, 0.0  ;;  %v304_v54 = vsel %vm145_vm1, %v297_v48, 0.0  ;;  %v415_v47 = vld [vmem:[#allocation11 + $0x68] sm:$0xff] }
  0xf2   :  { %v316_v55 = vadd.f32 %v315_v53, %v314_v49  ;;  %v305_v56 = vadd.f32 %v304_v54, %v303_v50  ;;  %v129_v57 = vpop.permute.xlu1 %128  ;;  %v125_v58 = vpop.permute.xlu0 %124  ;;  %v955_v48 = vpack.c.bf16 %v415_v47, %v414_v46  ;;  %v416_v49 = vld [vmem:[#allocation11 + $0x70] sm:$0xff]  ;;  %v417_v50 = vld [vmem:[#allocation11 + $0x78] sm:$0xff] }
  0xf3   :  { %v142_v59 = vmul.f32 %v129_v57, %v116_v51  ;;  %v141_v60 = vmul.f32 %v125_v58, %v115_v52  ;;  %v958_v51 = vpack.c.bf16 %v417_v50, %v416_v49  ;;  %v252_v52 = vld [vmem:[#allocation11 + $0x10] sm:$0xff]  ;;  %v253_v53 = vld [vmem:[#allocation11 + $0x18] sm:$0xff] }
  0xf4   :  { %v317_v61 = vrot.slane %v316_v55, 4  ;;  %v306_v62 = vrot.slane %v305_v56, 4  ;;  %v964_v54 = vpack.c.bf16 %v253_v53, %v252_v52  ;;  %v256_v58 = vld [vmem:[#allocation11 + $0x30] sm:$0xff]  ;;  %v692_v46 = vld [vmem:[#allocation11 + $0xb8] sm:$0xff] }
  0xf5   :  { %v147_v1 = vsel %vm145_vm1, %v142_v59, 0.0  ;;  %v146_v2 = vsel %vm145_vm1, %v141_v60, 0.0  ;;  %v257_v59 = vld [vmem:[#allocation11 + $0x38] sm:$0xff]  ;;  %v800_v49 = vld [vmem:[%s1408_s7 + $0x2] ss:$0 sm:$0xff] }
  0xf6   :  { %v318_v3 = vadd.f32 %v317_v61, %v316_v55  ;;  %v307_v4 = vadd.f32 %v306_v62, %v305_v56  ;;  %v148_v5 = vadd.f32 %v147_v1, %v146_v2  ;;  %v140_v6 = vpop.permute.xlu1 %139  ;;  %v136_v7 = vpop.permute.xlu0 %135  ;;  %v254_v55 = vld [vmem:[#allocation11 + $0x20] sm:$0xff]  ;;  %v255_v56 = vld [vmem:[#allocation11 + $0x28] sm:$0xff]  ;;  %v970_v60 = vpack.c.bf16 %v257_v59, %v256_v58 }
  0xf7   :  { %v144_v8 = vmul.f32 %v140_v6, %v118_v63  ;;  %v143_v9 = vmul.f32 %v136_v7, %v117_v0  ;;  %v967_v57 = vpack.c.bf16 %v255_v56, %v254_v55  ;;  %v567_v61 = vld [vmem:[%s1406_s5 + $0x8] sm:$0xff]  ;;  %v566_v63 = vld [vmem:[%s1406_s5] sm:$0xff] }
  0xf8   :  { %v319_v10 = vrot.slane %v318_v3, 2  ;;  %v308_v12 = vrot.slane %v307_v4, 2  ;;  %v149_v13 = vrot.slane %v148_v5, 4 }
  0xf9   :  { %v156_v14 = vsel %vm145_vm1, %v144_v8, 0.0  ;;  %v155_v15 = vsel %vm145_vm1, %v143_v9, 0.0 }
  0xfa   :  { %v320_v16 = vadd.f32 %v319_v10, %v318_v3  ;;  %v309_v17 = vadd.f32 %v308_v12, %v307_v4  ;;  %v150_v18 = vadd.f32 %v149_v13, %v148_v5  ;;  %v157_v19 = vadd.f32 %v156_v14, %v155_v15  ;;  %v581_v62 = vpop.permute.xlu1 %580  ;;  %v574_v0 = vpop.permute.xlu0 %573  ;;  %v796_v12 = vld [vmem:[%s1408_s7 + $0x1] ss:$0 sm:$0xff]  ;;  %v599_v13 = vld [vmem:[#allocation10 + $0x40] sm:$0xff]  ;;  %v600_v14 = vld [vmem:[#allocation10 + $0x48] sm:$0xff] }
  0xfb   :  { %v583_v1 = vmul.f32 %v581_v62, %v567_v61  ;;  %v582_v2 = vmul.f32 %v574_v0, %v566_v63  ;;  %v973_v21 = vpack.c.bf16 %v600_v14, %v599_v13 }
  0xfc   :  { %v321_v23 = vrot.slane %v320_v16, 1  ;;  %v310_v24 = vrot.slane %v309_v17, 1  ;;  %v151_v25 = vrot.slane %v150_v18, 2  ;;  %v158_v26 = vrot.slane %v157_v19, 4 }
  0xfd   :  { %v591_v3 = vsel %vm145_vm1, %v583_v1, 0.0  ;;  %v584_v4 = vsel %vm145_vm1, %v582_v2, 0.0 }
  0xfe   :  { %v152_v28 = vadd.f32 %v151_v25, %v150_v18  ;;  %v159_v29 = vadd.f32 %v158_v26, %v157_v19  ;;  %v311_v30 = vadd.f32 %v310_v24, %v309_v17  ;;  %v322_v31 = vadd.f32 %v321_v23, %v320_v16  ;;  %v601_v23 = vld [vmem:[#allocation10 + $0x50] sm:$0xff]  ;;  %v602_v24 = vld [vmem:[#allocation10 + $0x58] sm:$0xff] }
  0xff   :  { %v592_v5 = vrot.slane %v591_v3, 4  ;;  %v585_v6 = vrot.slane %v584_v4, 4 }
 0x100   :  { %v153_v32 = vrot.slane %v152_v28, 1  ;;  %v160_v33 = vrot.slane %v159_v29, 2  ;;  %v335_v34 = vsel %vm175_vm2, %v322_v31, %v311_v30  ;;  %v686_v30 = vld [vmem:[#allocation11 + $0x88] sm:$0xff] }
 0x101   :  { %866 = vmatmul.mubr.msk.f32.vlgmr.msra.gmra.mrb[0].mxu1 %vm145_vm1, %v335_v34  ;;  %v593_v7 = vadd.f32 %v592_v5, %v591_v3  ;;  %v586_v8 = vadd.f32 %v585_v6, %v584_v4 }
 0x102   :  { %v161_v35 = vadd.f32 %v160_v33, %v159_v29  ;;  %962 = vmatpush3.bf16.msra.mxu1 %v961_v27  ;;  %903 = vmatprep.mubr.msk.f32.mxu1 %vm1175_vm0, %v1176_v20  ;;  %v154_v39 = vadd.f32 %v153_v32, %v152_v28  ;;  %v794_v27 = vld [vmem:[%s1408_s7] ss:$0 sm:$0xff]  ;;  %v976_v28 = vpack.c.bf16 %v602_v24, %v601_v23  ;;  %v685_v29 = vld [vmem:[#allocation11 + $0x80] sm:$0xff]  ;;  %s1134_s7 = scalar_lea.vmem %s783_s13, 32 }
 0x103   :  { %963 = vmatprep.subr.bf16.mxu1 %v1174_v11  ;;  %v594_v9 = vrot.slane %v593_v7, 2  ;;  %v587_v10 = vrot.slane %v586_v8, 2  ;;  %v979_v36 = vpack.c.bf16 %v686_v30, %v685_v29  ;;  %p1135_p6 = scmp.ne.s32.totalorder %s783_s13, %s1134_s7  ;;  %p1140_p8 = scmp.lt.s32.totalorder %s1134_s7, %s1134_s7 }
 0x104   :  { %v162_v38 = vrot.slane %v161_v35, 1 }
 0x105   :  { %v595_v15 = vadd.f32 %v594_v9, %v593_v7  ;;  %v588_v16 = vadd.f32 %v587_v10, %v586_v8  ;;  %p1141_p9 = por %p1140_p8, %p1139_p7 }
 0x106   :  { %v163_v40 = vadd.f32 %v162_v38, %v161_v35  ;;  %965 = vmatpush3.bf16.msra.mxu1 %v964_v54 }
 0x107   :  { %966 = vmatprep.subr.bf16.mxu1 %v1174_v11  ;;  %v596_v25 = vrot.slane %v595_v15, 1  ;;  %v589_v26 = vrot.slane %v588_v16, 1  ;;  %p1142_p10 = pnand %p1141_p9, %p1135_p6 }
 0x108   :  { %v176_v44 = vsel %vm175_vm2, %v163_v40, %v154_v39  ;;  %v687_v39 = vld [vmem:[#allocation11 + $0x90] sm:$0xff]  ;;  %v688_v40 = vld [vmem:[#allocation11 + $0x98] sm:$0xff] }
 0x109   :  { %855 = vmatmul.mubr.msk.f32.vlgmr.msra.gmra.mrb[0].mxu0 %vm145_vm1, %v176_v44  ;;  %v597_v31 = vadd.f32 %v596_v25, %v595_v15  ;;  %v590_v32 = vadd.f32 %v589_v26, %v588_v16  ;;  %v985_v44 = vpack.c.bf16 %v690_v43, %v689_v42 }
 0x10a   :  { %950 = vmatpush3.bf16.msra.mxu0 %v949_v41  ;;  %884 = vmatprep.mubr.msk.f32.mxu0 %vm1175_vm0, %v1176_v20  ;;  %v982_v41 = vpack.c.bf16 %v688_v40, %v687_v39 }
 0x10b   :  { %951 = vmatprep.subr.bf16.mxu0 %v1174_v11  ;;  %968 = vmatpush3.bf16.msra.mxu1 %v967_v57  ;;  %v610_v38 = vsel %vm175_vm2, %v597_v31, %v590_v32  ;;  %v803_v57 = vld [vmem:[%s1410_s9] ss:$0 sm:$0xff] }
 0x10c   :  { %969 = vmatprep.subr.bf16.mxu1 %v1174_v11 }
 0x10e   :  { %953 = vmatpush3.bf16.msra.mxu0 %v952_v45  ;;  %v691_v45 = vld [vmem:[#allocation11 + $0xb0] sm:$0xff] }
 0x10f   :  { %954 = vmatprep.subr.bf16.mxu0 %v1174_v11  ;;  %971 = vmatpush3.bf16.msra.mxu1 %v970_v60  ;;  %v988_v47 = vpack.c.bf16 %v692_v46, %v691_v45 }
 0x110   :  { %978 = vmatprep.subr.bf16.mxu1 %v1174_v11 }
 0x112   :  { %956 = vmatpush3.bf16.msra.mxu0 %v955_v48 }
 0x113   :  { %957 = vmatprep.subr.bf16.mxu0 %v1174_v11 }
 0x116   :  { %959 = vmatpush3.bf16.msra.mxu0 %v958_v51 }
 0x117   :  { %972 = vmatprep.subr.bf16.mxu0 %v1174_v11 }
 0x1d4   :  { %v404_v17 = vpop.f32.mrb[0].mxu1 }
 0x1d5   :  { %v405_v18 = vadd.f32 %v796_v12, %v404_v17  ;;  %v867_v19 = vpop.f32.mrb[1].mxu1 }
 0x1d7   :  { %v408_v22 = vmax.f32 %v405_v18, 0.0 }
 0x1d9   :  { %885 = vmatmul.mubr.msk.f32.vlgmr.msra.gmra.mrb[2].mxu0 %vm418_vm3, %v408_v22 }
 0x1da   :  { %974 = vmatpush3.bf16.msra.mxu0 %v973_v21  ;;  %914 = vmatprep.mubr.msk.f32.mxu0 %vm1175_vm0, %v1176_v20 }
 0x1db   :  { %975 = vmatprep.subr.bf16.mxu0 %v1174_v11 }
 0x1dc   :  { %v245_v33 = vpop.f32.mrb[0].mxu0 }
 0x1dd   :  { %v246_v34 = vadd.f32 %v794_v27, %v245_v33  ;;  %v856_v35 = vpop.f32.mrb[1].mxu0 }
 0x1de   :  { %977 = vmatpush3.bf16.msra.mxu0 %v976_v28 }
 0x1df   :  { %v249_v37 = vmax.f32 %v246_v34, 0.0 }
 0x1e1   :  { %915 = vmatmul.mubr.msk.f32.vlgmr.msra.gmra.mrb[4].mxu0 %vm145_vm1, %v610_v38  ;;  %904 = vmatmul.mubr.msk.f32.vlgmr.msra.gmra.mrb[2].mxu1 %vm418_vm3, %v249_v37 }
 0x1e2   :  { %980 = vmatpush3.bf16.msra.mxu1 %v979_v36  ;;  %933 = vmatprep.mubr.msk.f32.mxu1 %vm1175_vm0, %v1176_v20 }
 0x1e3   :  { %981 = vmatprep.subr.bf16.mxu1 %v1174_v11 }
 0x1e6   :  { %983 = vmatpush3.bf16.msra.mxu1 %v982_v41 }
 0x1e7   :  { %984 = vmatprep.subr.bf16.mxu1 %v1174_v11 }
 0x1ea   :  { %986 = vmatpush3.bf16.msra.mxu1 %v985_v44 }
 0x1eb   :  { %987 = vmatprep.subr.bf16.mxu1 %v1174_v11 }
 0x1ee   :  { %989 = vmatpush3.bf16.msra.mxu1 %v988_v47 }
 0x2ac   :  { %v488_v48 = vpop.f32.mrb[2].mxu0 }
 0x2ad   :  { %v886_v20 = vpop.f32.mrb[3].mxu0 }
 0x2b4   :  { %v679_v50 = vpop.f32.mrb[4].mxu0  ;;  %v561_v51 = vpop.f32.mrb[2].mxu1 }
 0x2b5   :  { %v680_v52 = vadd.f32 %v800_v49, %v679_v50  ;;  %v562_v53 = vadd.f32 %v561_v51, %v488_v48  ;;  %v916_v54 = vpop.f32.mrb[5].mxu0  ;;  %v905_v55 = vpop.f32.mrb[3].mxu1 }
 0x2b7   :  { %v683_v56 = vmax.f32 %v680_v52, 0.0 }
 0x2b9   :  { %934 = vmatmul.mubr.msk.f32.vlgmr.msra.gmra.mrb[4].mxu1 %vm418_vm3, %v683_v56 }
 0x38c   :  { %v762_v11 = vpop.f32.mrb[4].mxu1 }
 0x38d   :  { %v766_v58 = vadd.f32 %v762_v11, %v562_v53  ;;  %v935_v59 = vpop.f32.mrb[5].mxu1 }
 0x38f   :  { %v774_v60 = vadd.f32 %v803_v57, %v766_v58 }
 0x391   :  { %775 = vst [vmem:[#allocation13] sm:$0x3] %v774_v60 }
 0x392   :  { %1145 = shalt.err (!%p1142_p10)
}
 0x393   :  { %s1146_s18 = scalar_lea.hbm %s1411_s10, 32 }
 0x394   :  { %p1147_p11 = scmp.ne.s32.totalorder %s1411_s10, %s1146_s18  ;;  %p1150_p12 = scmp.lt.u32.totalorder %s1146_s18, %s1411_s10 }
 0x396   :  { %p1152_p13 = pnand %p1150_p12, %p1147_p11 }
 0x398   :  { %1155 = shalt.err (!%p1152_p13)
}
 0x399   :  { %785 = dma.vmem_to_hbm [thread:$0]  %s783_s13, 32, %s1411_s10, [#allocation4]  }
 0x39a   :  { %1164 = dma.done.wait [#allocation4], 32  }
 0x39b   :  { %1165 = vsyncadd [#allocation4], 4294967264 }
 0x39c   :  { %789 = vsyncpa [#allocation3], 1 }
 0x39d   :  { %790 = vsyncpa [#allocation6], 1 }
 0x39e   :  { %791 = vsyncpa [#allocation9], 1 }
 0x39f   :  { %792 = vsyncpa [#allocation12], 1 }
 0x3a0   :  { %793 = vsyncpa [#allocation4], 1 }

</bundles_post_ra>
